<compile_context>
chip_gen: v6e
topology: v6e:2x2x1
jax: 0.10.0
libtpu: 0.0.40
codegen_flags: <defaults>
</compile_context>

<pallas_src>
import functools

import jax
import jax.numpy as jnp
from jax import lax
from jax.experimental import pallas as pl
from jax.experimental.pallas import tpu as pltpu

_SUBLANE = 8
_LANE = 128
# Working-set budget counted for double-buffered input blocks + f32 accumulator.
_VMEM_BUDGET = 24 * 1024 * 1024
# Scoped-VMEM limit handed to the compiler (~2x budget headroom; < v7x 64 MiB physical).
_VMEM_LIMIT = 48 * 1024 * 1024


def _round_up(x, m):
    return ((x + m - 1) // m) * m


def _pick_config(B, D, itemsize, block_b=None, block_k=None):
    """Choose (tb_i, tb_j, tk, dp, im_resident).

    tb_i / tb_j: row / column batch tiles.  tk: contraction tile.  dp: padded D.
    im_resident: True -> im block is (tb_i, dp) indexed (i, 0) (1 HBM pass over im).
    """
    dp = D if D < _LANE else _round_up(D, _LANE)

    # ---- batch tiles -------------------------------------------------------
    if block_b is not None:
        tb_list = [(int(block_b), int(block_b))]
    elif B > 512:
        tb_list = [(512, 512), (256, 256)]
    elif B > 256:
        tb_list = [(256, 256)]
    elif B > 128:
        # Single row-block problem: split columns into two 128-wide tiles so a
        # 2-TensorCore chip (v7x) can shard the "parallel" j axis.
        tb_list = [(_round_up(B, _SUBLANE), 128)]
    else:
        t = _round_up(B, _SUBLANE)
        tb_list = [(t, t)]

    fallback = None
    for tb_i, tb_j in tb_list:
        acc_bytes = tb_i * tb_j * 4

        if block_k is not None:  # test / debug override of the K tiling
            tk = max(int(block_k), 1)
            if dp >= _LANE:
                tk = _round_up(tk, _LANE)
            if tk >= dp:
                return tb_i, tb_j, dp, dp, True
            dpk = _round_up(dp, tk)
            resident = ((2 * tb_i * dpk + 2 * tb_j * tk) * itemsize + acc_bytes
                        <= _VMEM_BUDGET)
            return tb_i, tb_j, tk, dpk, resident

        # Path A: one K block covering all of (padded) D -> no k loop, no scratch.
        if 2 * (tb_i + tb_j) * dp * itemsize <= _VMEM_BUDGET:
            return tb_i, tb_j, dp, dp, True

        # Path B: full-D im panel resident across j/k, s streamed over k.
        for tk in (512, 256, 128):
            if tk >= dp or dp % tk:
                continue
            if (2 * tb_i * dp + 2 * tb_j * tk) * itemsize + acc_bytes <= _VMEM_BUDGET:
                return tb_i, tb_j, tk, dp, True

        # Path C: stream both operands over k (gigantic-D fallback).
        for tk in (512, 256, 128):
            if tk >= dp or dp % tk:
                continue
            if 2 * (tb_i + tb_j) * tk * itemsize + acc_bytes <= _VMEM_BUDGET:
                fallback = (tb_i, tb_j, tk, dp, False)
                break

    if fallback is None:
        raise ValueError(f"Unsupported shape for contrastive_loss: B={B}, D={D}")
    return fallback


def _contrastive_loss_kernel(dcol_ref, drow_ref, im_ref, s_ref, out_ref, *acc,
                             margin, batch, tk, n_k):
    i = pl.program_id(0)
    j = pl.program_id(1)
    k = pl.program_id(2)

    # LHS stripe for this k step: the whole im block, or a 128-aligned slice of the
    # resident (tb_i, dp) panel.
    if im_ref.shape[1] == tk:
        im_blk = im_ref[...]
    else:
        im_blk = im_ref[:, pl.ds(pl.multiple_of(k * tk, tk), tk)]

    # scores_block (+)= im_blk @ s_blk^T ; contraction on dim 1 of BOTH operands keeps
    # s in its native (tb_j, tk) layout.  f32 accumulation on the MXU.
    part = lax.dot_general(
        im_blk, s_ref[...],
        dimension_numbers=(((1,), (1,)), ((), ())),
        preferred_element_type=jnp.float32,
    )

    def finalize(scores):
        tm, tn = scores.shape
        ms = scores + margin                                  # margin added once
        hinge = (jnp.maximum(ms - dcol_ref[...], 0.0)         # cost_s
                 + jnp.maximum(ms - drow_ref[...], 0.0))      # cost_im

        row0 = i * tm
        col0 = j * tn
        # Does this block touch the diagonal or the batch-padding edge?
        needs_mask = (((row0 < col0 + tn) & (col0 < row0 + tm))
                      | (row0 + tm > batch) | (col0 + tn > batch))

        @pl.when(needs_mask)
        def _():
            row = lax.broadcasted_iota(jnp.int32, (tm, tn), 0) + row0
            col = lax.broadcasted_iota(jnp.int32, (tm, tn), 1) + col0
            keep = (row != col) & (row < batch) & (col < batch)
            p = jnp.sum(jnp.where(keep, hinge, 0.0))
            out_ref[...] = jnp.full(out_ref.shape, p, jnp.float32)

        @pl.when(jnp.logical_not(needs_mask))
        def _():
            # Interior fast path: no iota / mask construction at all.
            out_ref[...] = jnp.full(out_ref.shape, jnp.sum(hinge), jnp.float32)

    if n_k == 1:
        finalize(part)
    else:
        acc_ref = acc[0]

        @pl.when(k == 0)
        def _():
            acc_ref[...] = jnp.zeros_like(acc_ref)

        acc_ref[...] += part

        @pl.when(k == n_k - 1)
        def _():
            finalize(acc_ref[...])


def contrastive_loss(im, s, margin=0.0, measure=False, max_violation=False, *,
                     use_bf16_matmul=False, block_b=None, block_k=None):
    """Pallas TPU ContrastiveLoss(margin, measure=cosine, max_violation=False).forward.

    im, s: (B, D) image / sentence embeddings (f32 or bf16).  Returns a scalar f32.
    """
    if measure == "order":
        # TODO(synk): order_sim (order-embedding similarity) path not implemented.
        raise NotImplementedError("measure='order' is not supported by this kernel")
    if max_violation:
        # TODO(synk): max_violation=True (row/col max instead of sum) not implemented.
        raise NotImplementedError("max_violation=True is not supported by this kernel")
    assert im.ndim == 2 and s.ndim == 2 and im.shape == s.shape
    B, D = im.shape

    if use_bf16_matmul and im.dtype == jnp.float32:
        im = im.astype(jnp.bfloat16)
        s = s.astype(jnp.bfloat16)

    itemsize = jnp.dtype(im.dtype).itemsize
    tb_i, tb_j, tk, dp, im_resident = _pick_config(B, D, itemsize, block_b, block_k)
    bp_i = _round_up(B, tb_i)
    bp_j = _round_up(B, tb_j)
    n_i = bp_i // tb_i
    n_j = bp_j // tb_j
    n_k = dp // tk

    # diag[i] = <im_i, s_i>, hoisted out of the kernel (elementwise mul + f32 reduce).
    diag = jnp.sum(im.astype(jnp.float32) * s.astype(jnp.float32), axis=1)

    # Zero-pad to the tile grid; padded rows/cols are masked inside the kernel and
    # zero-padding along D is exact for both the matmul and diag.
    im_p = im if (bp_i, dp) == (B, D) else jnp.pad(im, ((0, bp_i - B), (0, dp - D)))
    s_p = s if (bp_j, dp) == (B, D) else jnp.pad(s, ((0, bp_j - B), (0, dp - D)))
    d_col = (diag if bp_i == B else jnp.pad(diag, (0, bp_i - B))).reshape(bp_i, 1)
    d_row = (diag if bp_j == B else jnp.pad(diag, (0, bp_j - B))).reshape(1, bp_j)

    if im_resident:
        im_spec = pl.BlockSpec((tb_i, dp), lambda i, j, k: (i, 0))   # 1 HBM pass
    else:
        im_spec = pl.BlockSpec((tb_i, tk), lambda i, j, k: (i, k))   # streamed over k

    kernel = functools.partial(_contrastive_loss_kernel, margin=float(margin),
                               batch=B, tk=tk, n_k=n_k)
    scratch = [] if n_k == 1 else [pltpu.VMEM((tb_i, tb_j), jnp.float32)]

    partials = pl.pallas_call(
        kernel,
        out_shape=jax.ShapeDtypeStruct((n_i * _SUBLANE, n_j * _LANE), jnp.float32),
        grid_spec=pltpu.PrefetchScalarGridSpec(
            num_scalar_prefetch=0,
            grid=(n_i, n_j, n_k),
            in_specs=[
                pl.BlockSpec((tb_i, 1), lambda i, j, k: (i, 0)),   # diag, row block i
                pl.BlockSpec((1, tb_j), lambda i, j, k: (0, j)),   # diag, col block j
                im_spec,                                           # im
                pl.BlockSpec((tb_j, tk), lambda i, j, k: (j, k)),  # s
            ],
            out_specs=pl.BlockSpec((_SUBLANE, _LANE), lambda i, j, k: (i, j)),
            scratch_shapes=scratch,
        ),
        compiler_params=pltpu.CompilerParams(
            dimension_semantics=("parallel", "parallel", "arbitrary"),
            vmem_limit_bytes=_VMEM_LIMIT,
        ),
    )(d_col, d_row, im_p, s_p)

    # Each (i, j) tile holds its partial sum broadcast across the whole (8, 128) tile;
    # take one representative element per tile and reduce (exact).
    return jnp.sum(partials[::_SUBLANE, ::_LANE])


def _reference_loss(im, s, margin=0.0):
    """Pure-JAX reference mirroring the PyTorch forward, for validation."""
    im = im.astype(jnp.float32)
    s = s.astype(jnp.float32)
    scores = jnp.dot(im, s.T, precision="highest")
    diag = jnp.diag(scores)
    d1 = diag[:, None]
    d2 = diag[None, :]
    cost_s = jnp.maximum(margin + scores - d1, 0.0)
    cost_im = jnp.maximum(margin + scores - d2, 0.0)
    eye = jnp.eye(scores.shape[0], dtype=bool)
    cost_s = jnp.where(eye, 0.0, cost_s)
    cost_im = jnp.where(eye, 0.0, cost_im)
    return jnp.sum(cost_s) + jnp.sum(cost_im)


if __name__ == "__main__":
    key = jax.random.PRNGKey(0)
    keys = jax.random.split(key, 8)

    # 1) Tiny single-block case (B=8, D=32).
    im1 = jax.random.normal(keys[0], (8, 32), jnp.float32)
    s1 = jax.random.normal(keys[1], (8, 32), jnp.float32)
    out1 = jax.block_until_ready(contrastive_loss(im1, s1, margin=0.1))
    ref1 = _reference_loss(im1, s1, margin=0.1)
    assert jnp.allclose(out1, ref1, rtol=2e-3, atol=1e-2), (out1, ref1)

    # 2) Multi-block (i, j) grid with batch padding and a single full-D K block
    #    (B=300 -> 2x2 grid of 256-row tiles; D=640 -> tk=640, n_k=1).
    im2 = jax.random.normal(keys[2], (300, 640), jnp.float32)
    s2 = jax.random.normal(keys[3], (300, 640), jnp.float32)
    out2 = jax.block_until_ready(contrastive_loss(im2, s2, margin=0.2))
    ref2 = _reference_loss(im2, s2, margin=0.2)
    assert jnp.allclose(out2, ref2, rtol=2e-3, atol=1e-1), (out2, ref2)

    # 3) Single row-block with the column axis split in two (tb_i != tb_j; the v7x
    #    2-TensorCore-friendly layout), plus batch padding on the column axis.
    im3 = jax.random.normal(keys[4], (160, 96), jnp.float32)
    s3 = jax.random.normal(keys[5], (160, 96), jnp.float32)
    out3 = jax.block_until_ready(contrastive_loss(im3, s3, margin=0.2))
    ref3 = _reference_loss(im3, s3, margin=0.2)
    assert jnp.allclose(out3, ref3, rtol=2e-3, atol=1e-1), (out3, ref3)

    # 4) Forced k loop (block_k=128 -> n_k=3): covers the resident-im in-kernel
    #    slicing and the accumulator init / finalize path.
    im4 = jax.random.normal(keys[6], (128, 384), jnp.float32)
    s4 = jax.random.normal(keys[7], (128, 384), jnp.float32)
    out4 = jax.block_until_ready(contrastive_loss(im4, s4, margin=0.2, block_k=128))
    ref4 = _reference_loss(im4, s4, margin=0.2)
    assert jnp.allclose(out4, ref4, rtol=2e-3, atol=1e-1), (out4, ref4)

    # 5) Opt-in bf16 matmul path (looser tolerance).
    out5 = jax.block_until_ready(
        contrastive_loss(im2, s2, margin=0.2, use_bf16_matmul=True))
    assert jnp.allclose(out5, ref2, rtol=3e-2, atol=1.0), (out5, ref2)

    print("KERNEL_OK")
</pallas_src>

<mosaic_0001>
module attributes {stable_mosaic.version = 11 : i64} {
  func.func @_contrastive_loss_kernel(%arg0: i32, %arg1: i32, %arg2: i32, %arg3: memref<8x1xf32, #tpu.memory_space<vmem>>, %arg4: memref<1x8xf32, #tpu.memory_space<vmem>>, %arg5: memref<8x32xf32, #tpu.memory_space<vmem>>, %arg6: memref<8x32xf32, #tpu.memory_space<vmem>>, %arg7: memref<8x128xf32, #tpu.memory_space<vmem>>) attributes {dimension_semantics = [#tpu.dimension_semantics<parallel>, #tpu.dimension_semantics<parallel>, #tpu.dimension_semantics<arbitrary>], iteration_bounds = array<i64: 1, 1, 1>, scalar_prefetch = 0 : i64, scratch_operands = 0 : i64, tpu.core_type = #tpu.core_type<tc>, window_params = [{transform_indices = @transform_0, window_bounds = array<i64: 8, 1>}, {transform_indices = @transform_1, window_bounds = array<i64: 1, 8>}, {transform_indices = @transform_2, window_bounds = array<i64: 8, 32>}, {transform_indices = @transform_3, window_bounds = array<i64: 8, 32>}, {transform_indices = @transform_4, window_bounds = array<i64: 8, 128>}]} {
    %c0 = arith.constant 0 : index
    %c0_0 = arith.constant 0 : index
    %0 = vector.load %arg5[%c0, %c0_0] : memref<8x32xf32, #tpu.memory_space<vmem>>, vector<8x32xf32>
    %c0_1 = arith.constant 0 : index
    %c0_2 = arith.constant 0 : index
    %1 = vector.load %arg6[%c0_1, %c0_2] : memref<8x32xf32, #tpu.memory_space<vmem>>, vector<8x32xf32>
    %cst = arith.constant dense<0.000000e+00> : vector<8x8xf32>
    %2 = tpu.matmul %0, %1, %cst {dimension_numbers = #tpu.dot_dimension_numbers<[1], [1], [0], [0], [0, 0, 1, 0], [], []>} : vector<8x32xf32>, vector<8x32xf32>, vector<8x8xf32> -> vector<8x8xf32>
    %cst_3 = arith.constant 1.000000e-01 : f32
    %3 = vector.broadcast %cst_3 : f32 to vector<8x8xf32>
    %4 = arith.addf %2, %3 : vector<8x8xf32>
    %c0_4 = arith.constant 0 : index
    %c0_5 = arith.constant 0 : index
    %5 = vector.load %arg3[%c0_4, %c0_5] : memref<8x1xf32, #tpu.memory_space<vmem>>, vector<8x1xf32>
    %6 = vector.broadcast %5 : vector<8x1xf32> to vector<8x8xf32>
    %7 = arith.subf %4, %6 : vector<8x8xf32>
    %cst_6 = arith.constant 0.000000e+00 : f32
    %8 = vector.broadcast %cst_6 : f32 to vector<8x8xf32>
    %9 = arith.maximumf %7, %8 : vector<8x8xf32>
    %c0_7 = arith.constant 0 : index
    %c0_8 = arith.constant 0 : index
    %10 = vector.load %arg4[%c0_7, %c0_8] : memref<1x8xf32, #tpu.memory_space<vmem>>, vector<1x8xf32>
    %11 = vector.broadcast %10 : vector<1x8xf32> to vector<8x8xf32>
    %12 = arith.subf %4, %11 : vector<8x8xf32>
    %cst_9 = arith.constant 0.000000e+00 : f32
    %13 = vector.broadcast %cst_9 : f32 to vector<8x8xf32>
    %14 = arith.maximumf %12, %13 : vector<8x8xf32>
    %15 = arith.addf %9, %14 : vector<8x8xf32>
    %c8_i32 = arith.constant 8 : i32
    %16 = arith.muli %arg0, %c8_i32 : i32
    %c8_i32_10 = arith.constant 8 : i32
    %17 = arith.muli %arg1, %c8_i32_10 : i32
    %c8_i32_11 = arith.constant 8 : i32
    %18 = arith.addi %17, %c8_i32_11 : i32
    %19 = arith.cmpi slt, %16, %18 : i32
    %c8_i32_12 = arith.constant 8 : i32
    %20 = arith.addi %16, %c8_i32_12 : i32
    %21 = arith.cmpi slt, %17, %20 : i32
    %22 = arith.andi %19, %21 : i1
    %c8_i32_13 = arith.constant 8 : i32
    %23 = arith.addi %16, %c8_i32_13 : i32
    %c8_i32_14 = arith.constant 8 : i32
    %24 = arith.cmpi sgt, %23, %c8_i32_14 : i32
    %25 = arith.ori %22, %24 : i1
    %c8_i32_15 = arith.constant 8 : i32
    %26 = arith.addi %17, %c8_i32_15 : i32
    %c8_i32_16 = arith.constant 8 : i32
    %27 = arith.cmpi sgt, %26, %c8_i32_16 : i32
    %28 = arith.ori %25, %27 : i1
    %29 = arith.extui %28 : i1 to i32
    %c0_i32 = arith.constant 0 : i32
    %30 = arith.cmpi ne, %29, %c0_i32 : i32
    scf.if %30 {
      %34 = tpu.iota {dimensions = array<i32: 0>} : vector<8x8xi32>
      %35 = vector.broadcast %16 : i32 to vector<8x8xi32>
      %36 = arith.addi %34, %35 : vector<8x8xi32>
      %37 = tpu.iota {dimensions = array<i32: 1>} : vector<8x8xi32>
      %38 = vector.broadcast %17 : i32 to vector<8x8xi32>
      %39 = arith.addi %37, %38 : vector<8x8xi32>
      %40 = arith.cmpi ne, %36, %39 : vector<8x8xi32>
      %c8_i32_18 = arith.constant 8 : i32
      %41 = vector.broadcast %c8_i32_18 : i32 to vector<8x8xi32>
      %42 = arith.cmpi slt, %36, %41 : vector<8x8xi32>
      %43 = arith.andi %40, %42 : vector<8x8xi1>
      %c8_i32_19 = arith.constant 8 : i32
      %44 = vector.broadcast %c8_i32_19 : i32 to vector<8x8xi32>
      %45 = arith.cmpi slt, %39, %44 : vector<8x8xi32>
      %46 = arith.andi %43, %45 : vector<8x8xi1>
      %cst_20 = arith.constant 0.000000e+00 : f32
      %47 = vector.broadcast %cst_20 : f32 to vector<8x8xf32>
      %48 = arith.select %46, %15, %47 : vector<8x8xi1>, vector<8x8xf32>
      %49 = vector.shape_cast %48 : vector<8x8xf32> to vector<1x8x8xf32>
      %cst_21 = arith.constant dense<0.000000e+00> : vector<1xf32>
      %50 = vector.multi_reduction <add>, %49, %cst_21 [1, 2] : vector<1x8x8xf32> to vector<1xf32>
      %51 = vector.shape_cast %50 : vector<1xf32> to vector<1x1x1xf32>
      %52 = vector.extract %51[0, 0, 0] : f32 from vector<1x1x1xf32>
      %53 = vector.broadcast %52 : f32 to vector<8x128xf32>
      %c0_22 = arith.constant 0 : index
      %c0_23 = arith.constant 0 : index
      %54 = vector.load %arg7[%c0_22, %c0_23] : memref<8x128xf32, #tpu.memory_space<vmem>>, vector<8x128xf32>
      tpu.vector_store %arg7[%c0_22, %c0_23], %53 {strides = array<i32>} : memref<8x128xf32, #tpu.memory_space<vmem>>, vector<8x128xf32>,
    } else {
    }
    %true = arith.constant true
    %31 = arith.xori %28, %true : i1
    %32 = arith.extui %31 : i1 to i32
    %c0_i32_17 = arith.constant 0 : i32
    %33 = arith.cmpi ne, %32, %c0_i32_17 : i32
    scf.if %33 {
      %34 = vector.shape_cast %15 : vector<8x8xf32> to vector<1x8x8xf32>
      %cst_18 = arith.constant dense<0.000000e+00> : vector<1xf32>
      %35 = vector.multi_reduction <add>, %34, %cst_18 [1, 2] : vector<1x8x8xf32> to vector<1xf32>
      %36 = vector.shape_cast %35 : vector<1xf32> to vector<1x1x1xf32>
      %37 = vector.extract %36[0, 0, 0] : f32 from vector<1x1x1xf32>
      %38 = vector.broadcast %37 : f32 to vector<8x128xf32>
      %c0_19 = arith.constant 0 : index
      %c0_20 = arith.constant 0 : index
      %39 = vector.load %arg7[%c0_19, %c0_20] : memref<8x128xf32, #tpu.memory_space<vmem>>, vector<8x128xf32>
      tpu.vector_store %arg7[%c0_19, %c0_20], %38 {strides = array<i32>} : memref<8x128xf32, #tpu.memory_space<vmem>>, vector<8x128xf32>,
    } else {
    }
    return
  }
  func.func @transform_0(%arg0: i32, %arg1: i32, %arg2: i32) -> (i32, i32) {
    %c0_i32 = arith.constant 0 : i32
    %c0_i32_0 = arith.constant 0 : i32
    return %arg0, %c0_i32 : i32, i32
  }
  func.func @transform_1(%arg0: i32, %arg1: i32, %arg2: i32) -> (i32, i32) {
    %c0_i32 = arith.constant 0 : i32
    %c0_i32_0 = arith.constant 0 : i32
    return %c0_i32, %arg1 : i32, i32
  }
  func.func @transform_2(%arg0: i32, %arg1: i32, %arg2: i32) -> (i32, i32) {
    %c0_i32 = arith.constant 0 : i32
    %c0_i32_0 = arith.constant 0 : i32
    return %arg0, %c0_i32 : i32, i32
  }
  func.func @transform_3(%arg0: i32, %arg1: i32, %arg2: i32) -> (i32, i32) {
    %c0_i32 = arith.constant 0 : i32
    return %arg1, %arg2 : i32, i32
  }
  func.func @transform_4(%arg0: i32, %arg1: i32, %arg2: i32) -> (i32, i32) {
    %c0_i32 = arith.constant 0 : i32
    return %arg0, %arg1 : i32, i32
  }
}

</mosaic_0001>

<bundles_post_ra>
// kernel: tpu_custom_call.1
= control target key start
LH: loop header
LB: loop body
LE: loop exit
PB: predicated region body
PF: predicated region fallthrough
CT: control target
= control target key end

     0   :  { %9 = vsyncpa [#allocation3], 0  ;;  %s307_s0 = inlined_call_operand.vmem [shape: f32[8,1], index: 0, kind: input, shape index: {}]   ;;  %s308_s1 = inlined_call_operand.vmem [shape: f32[1,8], index: 1, kind: input, shape index: {}]   ;;  %s309_s2 = inlined_call_operand.vmem [shape: f32[8,32], index: 2, kind: input, shape index: {}]   ;;  %s310_s3 = inlined_call_operand.hbm [shape: f32[8,32], index: 3, kind: input, shape index: {}]   ;;  %s311_s4 = inlined_call_operand.hbm [shape: f32[8,128], index: 4, kind: output, shape index: {}]  }
   0x1   :  { %10 = vsyncpa [#allocation4], 0  ;;  %s262_s15 = smov [#allocation2]  }
   0x2   :  { %s23_s16 = sshll.u32 %s262_s15, 4  ;;  %s24_s16 = int_to_ptr.vmem [resolvable:$true] %s23_s16 }
   0x3   :  { %s226_s17 = scalar_lea.vmem %s24_s16, 128  ;;  %p231_p1 = scmp.lt.s32.totalorder %s24_s16, %s24_s16 }
   0x4   :  { %p227_p0 = scmp.ne.s32.totalorder %s24_s16, %s226_s17  ;;  %p232_p2 = scmp.lt.s32.totalorder %s226_s17, %s226_s17 }
   0x6   :  { %p233_p3 = por %p232_p2, %p231_p1 }
   0x8   :  { %p234_p4 = pnand %p233_p3, %p227_p0 }
   0xa   :  { %237 = shalt.err (!%p234_p4)
}
   0xb   :  { %26 = dma.hbm_to_vmem [thread:$0]  %s310_s3, 128, %s24_s16, [#allocation3]  }
   0xc   :  { %258 = dma.done.wait [#allocation3], 128  }
   0xd   :  { %259 = vsyncadd [#allocation3], 4294967168  ;;  %v263_v0 = vmov 0.0   ;;  %vm264_vm0 = vmmov 0   ;;  %v265_v1 = vmov 0   ;;  %vm32_vm1 = vcmask 261120  }
   0xe   :  { %205 = vmatprep.subr.mxu0 %v263_v0  ;;  %207 = vmatprep.mubr.msk.f32.mxu0 %vm264_vm0, %v263_v0  ;;  %v31_v2 = vld [vmem:[#allocation2] sm:$0xff]  ;;  %v109_v3 = vld [vmem:[%s307_s0] sm:$0xff]  ;;  %v142_v5 = vlaneseq  ;;  %vm156_vm5 = vcmask 64512   ;;  %s266_s0 = smov [#allocation5]  }
   0xf   :  { %217 = vset.pattern.permute.xlu0 %v265_v1  ;;  %206 = vmatpush3.xpose.msk.msra.mxu0 %vm32_vm1, %v31_v2  ;;  %v30_v4 = vld [vmem:[%s309_s2] sm:$0xff] }
  0x10   :  { %112 = vperm.xlu0 %217, %v109_v3   ;;  %v143_v6 = vshrl.u32 %v142_v5, 7  ;;  %v147_v7 = vand.u32 127, %v142_v5  ;;  %v202_v9 = vld [vmem:[%s308_s1] ss:$0 sm:$0xff]  ;;  %s191_s1 = sshll.u32 %s266_s0, 4  ;;  %s192_s1 = int_to_ptr.vmem [resolvable:$true] %s191_s1 }
  0x11   :  { %s238_s25 = scalar_lea.vmem %s192_s1, 128  ;;  %p243_p6 = scmp.lt.s32.totalorder %s192_s1, %s192_s1 }
  0x12   :  { %208 = vmatmul.mubr.msk.f32.vlgmr.msra.gmra.mxu0 %vm32_vm1, %v30_v4  ;;  %vm150_vm2 = vcmp.ne.s32.totalorder %v143_v6, %v147_v7  ;;  %vm153_vm3 = vcmp.lt.s32.totalorder %v147_v7, 8  ;;  %p239_p5 = scmp.ne.s32.totalorder %s192_s1, %s238_s25  ;;  %p244_p7 = scmp.lt.s32.totalorder %s238_s25, %s238_s25 }
  0x13   :  { %vm154_vm4 = vmand %vm150_vm2, %vm153_vm3 }
  0x14   :  { %p245_p8 = por %p244_p7, %p243_p6 }
  0x16   :  { %p246_p9 = pnand %p245_p8, %p239_p5 }
  0x8b   :  { %v113_v10 = vpop.permute.xlu0 %112 }
  0xd2   :  { %v105_v8 = vpop.f32.mrf.mxu0 }
  0xd3   :  { %v106_v11 = vadd.f32 0.1, %v105_v8 }
  0xd4   :  { %v209_v12 = vpop.f32.mrf.mxu0 }
  0xd5   :  { %v124_v13 = vsub.f32 %v106_v11, %v202_v9  ;;  %v115_v14 = vsub.f32 %v106_v11, %v113_v10 }
  0xd7   :  { %v125_v15 = vmax.f32 %v124_v13, 0.0  ;;  %v116_v16 = vmax.f32 %v115_v14, 0.0 }
  0xd9   :  { %v126_v17 = vadd.f32 %v125_v15, %v116_v16 }
  0xdb   :  { %v155_v18 = vsel %vm154_vm4, %v126_v17, 0.0 }
  0xdc   :  { %v157_v19 = vsel %vm156_vm5, %v155_v18, 0.0 }
  0xdd   :  { %158 = vadd.xlane.f32.xlu0 %v157_v19 }
 0x166   :  { %v159_v20 = vpop.xlane.xlu0 %158 }
 0x167   :  { %v160_v21 = vrot.slane %v159_v20, 4 }
 0x169   :  { %v161_v22 = vadd.f32 %v160_v21, %v159_v20 }
 0x16b   :  { %v162_v23 = vrot.slane %v161_v22, 2 }
 0x16d   :  { %v163_v24 = vadd.f32 %v162_v23, %v161_v22 }
 0x16f   :  { %v164_v25 = vrot.slane %v163_v24, 1 }
 0x171   :  { %v165_v26 = vadd.f32 %v164_v25, %v163_v24 }
 0x173   :  { %210 = vpush %v165_v26 }
 0x1a4   :  { %s211_s2 = spop %210 }
 0x1a5   :  { %v167_v27 = vstv %s211_s2 }
 0x1a6   :  { %168 = vst [vmem:[#allocation5] sm:$0xff] %v167_v27 }
 0x1a7   :  { %249 = shalt.err (!%p246_p9)
}
 0x1a8   :  { %194 = dma.vmem_to_hbm [thread:$0]  %s192_s1, 128, %s311_s4, [#allocation4]  }
 0x1a9   :  { %260 = dma.done.wait [#allocation4], 128  }
 0x1aa   :  { %261 = vsyncadd [#allocation4], 4294967168 }
 0x1ab   :  { %198 = vsyncpa [#allocation3], 1 }
 0x1ac   :  { %199 = vsyncpa [#allocation4], 1 }

</bundles_post_ra>
